<compile_context>
chip_gen: v7x
topology: tpu7x:2x2x1
jax: 0.10.0
libtpu: 0.0.40
codegen_flags: <defaults>
</compile_context>

<pallas_src>
import jax
import jax.numpy as jnp
from jax.experimental import pallas as pl
from jax.experimental.pallas import tpu as pltpu


def _rope_kernel_factory(half, attention_scaling, out_dtype):
    scale = float(attention_scaling)

    def rope_kernel(pos_ref, inv_ref, cos_ref, sin_ref):
        # pos_ref: (1, S_BLK, 1) f32  -- S on sublanes, size-1 trailing lane dim
        # inv_ref: (1, half)     f32  -- frequency axis on lanes
        pos = pos_ref[...]                       # (1, S_BLK, 1)
        inv = inv_ref[...]                       # (1, half)
        # lane-broadcast multiply: (1, S_BLK, 1) * (1, 1, half) -> (1, S_BLK, half)
        freqs = pos * inv[:, None, :]
        c = jnp.cos(freqs)                       # EUP work on HALF width only
        s = jnp.sin(freqs)
        if scale != 1.0:                         # skip the VPU pass when scaling == 1
            c = c * scale
            s = s * scale
        c = c.astype(out_dtype)
        s = s.astype(out_dtype)
        # emb = concat(freqs, freqs) -> both halves of the output get the same values
        cos_ref[:, :, 0:half] = c
        cos_ref[:, :, half:2 * half] = c
        sin_ref[:, :, 0:half] = s
        sin_ref[:, :, half:2 * half] = s

    return rope_kernel


def llama_rotary_embedding(x, position_ids, inv_freq, attention_scaling=1.0,
                           s_blk=512):
    """Pallas implementation of LlamaRotaryEmbedding.forward.

    x:            (B, H, S, head_dim)  -- only dtype is used (matches torch)
    position_ids: (B, S) integer positions
    inv_freq:     (head_dim // 2,) f32
    returns (cos, sin), each (B, S, head_dim) in x.dtype
    """
    B, S = position_ids.shape
    half = int(inv_freq.shape[0])
    dim = 2 * half
    out_dtype = x.dtype

    # Tile size along S: multiple of 8, or the full S when S is small.
    s_blk = min(int(s_blk), S)
    if s_blk != S and s_blk % 8 != 0:
        s_blk = max(8, (s_blk // 8) * 8)
    grid = (B, pl.cdiv(S, s_blk))

    pos_f32 = position_ids.astype(jnp.float32).reshape(B, S, 1)   # S on sublanes
    inv_2d = inv_freq.astype(jnp.float32).reshape(1, half)        # freq on lanes

    kernel = _rope_kernel_factory(half, float(attention_scaling), out_dtype)

    # VMEM budget: 2 outputs x 2 pipeline buffers x tile + inputs + headroom,
    # clamped to [16 MiB, 64 MiB] (v7x physical VMEM is 64 MiB per core).
    out_itemsize = jnp.dtype(out_dtype).itemsize
    tile_bytes = (2 * 2 * s_blk * dim * out_itemsize      # cos/sin double buffers
                  + 2 * s_blk * 4                          # pos tile double buffer
                  + 2 * half * 4)                          # inv_freq
    vmem_limit = int(min(max(tile_bytes + (8 << 20), 16 << 20), 64 << 20))

    cos, sin = pl.pallas_call(
        kernel,
        out_shape=(
            jax.ShapeDtypeStruct((B, S, dim), out_dtype),
            jax.ShapeDtypeStruct((B, S, dim), out_dtype),
        ),
        grid=grid,
        in_specs=[
            pl.BlockSpec((1, s_blk, 1), lambda b, s: (b, s, 0)),
            pl.BlockSpec((1, half), lambda b, s: (0, 0)),   # resident, DMA'd once
        ],
        out_specs=(
            pl.BlockSpec((1, s_blk, dim), lambda b, s: (b, s, 0)),
            pl.BlockSpec((1, s_blk, dim), lambda b, s: (b, s, 0)),
        ),
        compiler_params=pltpu.CompilerParams(
            dimension_semantics=("parallel", "parallel"),
            vmem_limit_bytes=vmem_limit,
        ),
    )(pos_f32, inv_2d)
    return cos, sin


def _default_inv_freq(dim, base=10000.0):
    # matches transformers' default rope init: 1 / base^(arange(0, dim, 2)/dim)
    exponents = jnp.arange(0, dim, 2, dtype=jnp.float32) / float(dim)
    return 1.0 / (base ** exponents)


def _reference(x, position_ids, inv_freq, attention_scaling=1.0):
    # plain-JAX reference for correctness check
    pos = position_ids.astype(jnp.float32)
    freqs = pos[:, :, None] * inv_freq[None, None, :]
    emb = jnp.concatenate([freqs, freqs], axis=-1)
    cos = (jnp.cos(emb) * attention_scaling).astype(x.dtype)
    sin = (jnp.sin(emb) * attention_scaling).astype(x.dtype)
    return cos, sin


if __name__ == "__main__":
    key = jax.random.PRNGKey(0)

    # --- small test (matches original module's typical small config) ---
    B, H, S, head_dim = 2, 4, 8, 32
    x = jax.random.normal(key, (B, H, S, head_dim), dtype=jnp.float32)
    position_ids = jnp.broadcast_to(jnp.arange(S, dtype=jnp.int32), (B, S))
    inv_freq = _default_inv_freq(head_dim, base=10000.0)
    attention_scaling = 1.0

    cos, sin = llama_rotary_embedding(x, position_ids, inv_freq, attention_scaling)
    jax.block_until_ready((cos, sin))

    cos_ref, sin_ref = _reference(x, position_ids, inv_freq, attention_scaling)
    assert cos.shape == (B, S, head_dim) and sin.shape == (B, S, head_dim)
    assert cos.dtype == x.dtype and sin.dtype == x.dtype
    assert jnp.allclose(cos, cos_ref, atol=1e-5, rtol=1e-5)
    assert jnp.allclose(sin, sin_ref, atol=1e-5, rtol=1e-5)

    # --- larger test: exercises the (B, S) grid, multiple S tiles and bf16 cast ---
    B2, H2, S2, head_dim2 = 2, 4, 1024, 128
    x2 = jax.random.normal(key, (B2, H2, S2, head_dim2), dtype=jnp.bfloat16)
    position_ids2 = jnp.broadcast_to(jnp.arange(S2, dtype=jnp.int32), (B2, S2))
    inv_freq2 = _default_inv_freq(head_dim2, base=10000.0)

    cos2, sin2 = llama_rotary_embedding(x2, position_ids2, inv_freq2, 1.0)
    jax.block_until_ready((cos2, sin2))

    cos2_ref, sin2_ref = _reference(x2, position_ids2, inv_freq2, 1.0)
    assert cos2.shape == (B2, S2, head_dim2) and cos2.dtype == jnp.bfloat16
    assert jnp.allclose(cos2.astype(jnp.float32), cos2_ref.astype(jnp.float32),
                        atol=1e-2, rtol=1e-2)
    assert jnp.allclose(sin2.astype(jnp.float32), sin2_ref.astype(jnp.float32),
                        atol=1e-2, rtol=1e-2)

    print("KERNEL_OK")
</pallas_src>

<mosaic_0001>
module attributes {stable_mosaic.version = 11 : i64} {
  func.func @rope_kernel(%arg0: i32, %arg1: i32, %arg2: memref<1x8x1xf32, #tpu.memory_space<vmem>>, %arg3: memref<1x16xf32, #tpu.memory_space<vmem>>, %arg4: memref<1x8x32xf32, #tpu.memory_space<vmem>>, %arg5: memref<1x8x32xf32, #tpu.memory_space<vmem>>) attributes {dimension_semantics = [#tpu.dimension_semantics<parallel>, #tpu.dimension_semantics<parallel>], iteration_bounds = array<i64: 2, 1>, scalar_prefetch = 0 : i64, scratch_operands = 0 : i64, tpu.core_type = #tpu.core_type<tc>, window_params = [{transform_indices = @transform_0, window_bounds = array<i64: 1, 8, 1>}, {pipeline_mode = #tpu.pipeline_mode<synchronous>, transform_indices = @transform_1, window_bounds = array<i64: 1, 16>}, {transform_indices = @transform_2, window_bounds = array<i64: 1, 8, 32>}, {transform_indices = @transform_3, window_bounds = array<i64: 1, 8, 32>}]} {
    %c0 = arith.constant 0 : index
    %c0_0 = arith.constant 0 : index
    %c0_1 = arith.constant 0 : index
    %0 = vector.load %arg2[%c0, %c0_0, %c0_1] : memref<1x8x1xf32, #tpu.memory_space<vmem>>, vector<1x8x1xf32>
    %c0_2 = arith.constant 0 : index
    %c0_3 = arith.constant 0 : index
    %1 = vector.load %arg3[%c0_2, %c0_3] : memref<1x16xf32, #tpu.memory_space<vmem>>, vector<1x16xf32>
    %2 = vector.shape_cast %1 : vector<1x16xf32> to vector<1x1x16xf32>
    %3 = vector.broadcast %0 : vector<1x8x1xf32> to vector<1x8x16xf32>
    %4 = vector.broadcast %2 : vector<1x1x16xf32> to vector<1x8x16xf32>
    %5 = arith.mulf %3, %4 : vector<1x8x16xf32>
    %6 = math.cos %5 : vector<1x8x16xf32>
    %7 = math.sin %5 : vector<1x8x16xf32>
    %c0_4 = arith.constant 0 : index
    %c0_5 = arith.constant 0 : index
    %c0_6 = arith.constant 0 : index
    %8 = vector.load %arg4[%c0_4, %c0_5, %c0_6] : memref<1x8x32xf32, #tpu.memory_space<vmem>>, vector<1x8x16xf32>
    tpu.vector_store %arg4[%c0_4, %c0_5, %c0_6], %6 {strides = array<i32>} : memref<1x8x32xf32, #tpu.memory_space<vmem>>, vector<1x8x16xf32>,
    %c0_7 = arith.constant 0 : index
    %c0_8 = arith.constant 0 : index
    %c16 = arith.constant 16 : index
    %9 = vector.load %arg4[%c0_7, %c0_8, %c16] : memref<1x8x32xf32, #tpu.memory_space<vmem>>, vector<1x8x16xf32>
    tpu.vector_store %arg4[%c0_7, %c0_8, %c16], %6 {strides = array<i32>} : memref<1x8x32xf32, #tpu.memory_space<vmem>>, vector<1x8x16xf32>,
    %c0_9 = arith.constant 0 : index
    %c0_10 = arith.constant 0 : index
    %c0_11 = arith.constant 0 : index
    %10 = vector.load %arg5[%c0_9, %c0_10, %c0_11] : memref<1x8x32xf32, #tpu.memory_space<vmem>>, vector<1x8x16xf32>
    tpu.vector_store %arg5[%c0_9, %c0_10, %c0_11], %7 {strides = array<i32>} : memref<1x8x32xf32, #tpu.memory_space<vmem>>, vector<1x8x16xf32>,
    %c0_12 = arith.constant 0 : index
    %c0_13 = arith.constant 0 : index
    %c16_14 = arith.constant 16 : index
    %11 = vector.load %arg5[%c0_12, %c0_13, %c16_14] : memref<1x8x32xf32, #tpu.memory_space<vmem>>, vector<1x8x16xf32>
    tpu.vector_store %arg5[%c0_12, %c0_13, %c16_14], %7 {strides = array<i32>} : memref<1x8x32xf32, #tpu.memory_space<vmem>>, vector<1x8x16xf32>,
    return
  }
  func.func @transform_0(%arg0: i32, %arg1: i32) -> (i32, i32, i32) {
    %c0_i32 = arith.constant 0 : i32
    %c0_i32_0 = arith.constant 0 : i32
    return %arg0, %arg1, %c0_i32 : i32, i32, i32
  }
  func.func @transform_1(%arg0: i32, %arg1: i32) -> (i32, i32) {
    %c0_i32 = arith.constant 0 : i32
    %c0_i32_0 = arith.constant 0 : i32
    %c0_i32_1 = arith.constant 0 : i32
    return %c0_i32, %c0_i32_0 : i32, i32
  }
  func.func @transform_2(%arg0: i32, %arg1: i32) -> (i32, i32, i32) {
    %c0_i32 = arith.constant 0 : i32
    %c0_i32_0 = arith.constant 0 : i32
    return %arg0, %arg1, %c0_i32 : i32, i32, i32
  }
  func.func @transform_3(%arg0: i32, %arg1: i32) -> (i32, i32, i32) {
    %c0_i32 = arith.constant 0 : i32
    %c0_i32_0 = arith.constant 0 : i32
    return %arg0, %arg1, %c0_i32 : i32, i32, i32
  }
}

</mosaic_0001>

<bundles_post_ra>
// kernel: tpu_custom_call.1
= control target key start
LH: loop header
LB: loop body
LE: loop exit
PB: predicated region body
PF: predicated region fallthrough
CT: control target
= control target key end

     0   :  { %9 = vsyncpa [#allocation3], 0  ;;  %s990_s0 = inlined_call_operand.vmem [shape: f32[2,8,1], index: 0, kind: input, shape index: {}]   ;;  %s991_s1 = inlined_call_operand.vmem [shape: f32[1,16], index: 1, kind: input, shape index: {}]   ;;  %s992_s2 = inlined_call_operand.hbm [shape: f32[2,8,32], index: 2, kind: output, shape index: {0}]   ;;  %s993_s3 = inlined_call_operand.hbm [shape: f32[2,8,32], index: 3, kind: output, shape index: {1}]  }
   0x1   :  { %11 = vsyncpa [#allocation3 + $0x1], 0 }
   0x2   :  { %12 = vsyncpa [#allocation5], 0 }
   0x3   :  { %14 = vsyncpa [#allocation5 + $0x1], 0  ;;  %s819_s12 = smov 0   ;;  %s821_s13 = smov 0  }
   0x4   :  { %s823_s14 = smov 0   ;;  %s825_s15 = smov 0  }
   0x5   :  { %s827_s16 = smov 0   ;;  %s829_s17 = smov 0  }
   0x6 LB: > { %s577_s18 = sadd.s32 4294967295, %s787_s17   ;;  %s578_s19 = sadd.s32 4294967294, %s787_s17   ;;  %s787_s17 = sphi %s829_s17, %s20_s17   ;;  %s783_s16 = sphi %s827_s16, %s1000_s16   ;;  %s779_s15 = sphi %s825_s15, %s999_s15   ;;  %s775_s14 = sphi %s823_s14, %s998_s14   ;;  %s771_s13 = sphi %s821_s13, %s997_s13   ;;  %s767_s12 = sphi %s819_s12, %s996_s12  }
   0x7   : > { %s32_s20 = sadd.s32 1, %s783_s16  ;;  %s90_s21 = sadd.s32 1, %s775_s14 }
   0x8   : > { %p34_p0 = scmp.ge.s32.totalorder %s32_s20, 2  ;;  %p100_p1 = scmp.ne.s32.totalorder %s775_s14, %s771_s13 }
   0x9   : > { %p101_p2 = scmp.eq.s32.totalorder %s577_s18, 1  ;;  %p106_p3 = scmp.ne.s32.totalorder %s771_s13, %s767_s12 }
   0xa   : > { %s1002_s20 = smov (%p34_p0, %s32_s20), 0  ;;  %p107_p5 = scmp.eq.s32.totalorder %s578_s19, 1 }
   0xb   : > { %p859_p4 = por %p101_p2, %p100_p1  ;;  %s85_s23 = ssub.s32 %s783_s16, %s1002_s20 }
   0xc   : > { %p581_p6 = scmp.ge.s32.totalorder %s787_s17, 1  ;;  %p88_p7 = scmp.eq.s32.totalorder %s85_s23, 0 }
   0xd   : > { %p866_p8 = por %p107_p5, %p106_p3  ;;  %p166_p9 = scmp.lt.s32.totalorder %s787_s17, 3 }
   0xe   : > { %s872_s25 = scalar_select %p88_p7, %s775_s14, %s90_s21  }
   0xf   : > { %p167_p10 = pnand %p581_p6, %p166_p9 }
  0x10   : > { %p197_p11 = scmp.lt.s32.totalorder (!%p167_p10), %s779_s15, 1  ;;  %v789_v0 = vmov (!%p167_p10), 0   ;;  %v585_v2 = vld [vmem:[%s991_s1] ss:$0 sm:$0xff] (!%p167_p10)  ;;  %v790_v16 = vmov (!%p167_p10), 2102212464  }
  0x11   : > { %170 = sbr.rel (%p167_p10) target bundleno = 390 (0x186), region = 28  ;;  %672 = vset.pattern.permute.xlu0 (!%p167_p10), %v789_v0  ;;  %v791_v18 = vmov (!%p167_p10), 920167782   ;;  %v792_v22 = vmov (!%p167_p10), 1326507024   ;;  %s903_s6 = sand.u32 (!%p167_p10), 1, %s771_s13  }
  0x12   : > { %v793_v24 = vmov (!%p167_p10), 683565275   ;;  %v794_v26 = vmov (!%p167_p10), 2475754826   ;;  %v795_v29 = vmov (!%p167_p10), 2131351028  }
  0x13   : > { %s582_s7 = sshll.u32 (!%p167_p10), %s903_s6, 3  ;;  %vm425_vm10 = vcmask (!%p167_p10), 130048   ;;  %s796_s8 = smov (!%p167_p10), 16  }
  0x14   : > { %s196_s9 = scalar_lea.vmem (!%p167_p10), [#allocation4], %s582_s7  ;;  %s189_s10 = scalar_lea.vmem (!%p167_p10), [#allocation2], %s582_s7 }
  0x15   : > { %s596_s11 = sshll.u32 (!%p167_p10), %s779_s15, 7  ;;  %s459_s18 = sshll.u32 (!%p167_p10), %s189_s10, 4  ;;  %s915_s18 = int_to_ptr.vmem [resolvable:$true] %s459_s18 }
  0x16   : > { %s473_s19 = sshll.u32 (!%p167_p10), %s196_s9, 4  ;;  %s920_s29 = scalar_lea.hbm (!%p167_p10), %s993_s3, %s596_s11  ;;  %s922_s19 = int_to_ptr.vmem [resolvable:$true] %s473_s19 }
  0x17   : > { %s797_s4 = smov (!%p167_p10), [#allocation2]  }
  0x18   : > { %s198_s26 = scalar_select %p197_p11, %s779_s15, 1 }
  0x19   : > { %s440_s15 = scalar_lea.sflag [#allocation3], %s903_s6  ;;  %s681_s5 = sshll.u32 %s797_s4, 4  ;;  %s682_s5 = int_to_ptr.vmem [resolvable:$false] %s681_s5 }
  0x1a   : > { %s584_s27 = sshll.u32 %s198_s26, 3  ;;  %s913_s26 = scalar_lea.hbm %s992_s2, %s596_s11 }
  0x1b   : > { %s203_s30 = scalar_lea.vmem %s990_s0, %s584_s27  ;;  %s683_s7 = scalar_lea.vmem %s682_s5, 256 }
  0x1c   : > { %v204_v1 = vld [vmem:[%s203_s30] sm:$0xff]  ;;  %s677_s30 = scalar_lea.vmem %s915_s18, 128  ;;  %p684_p1 = scmp.lt.s32.totalorder %s915_s18, %s682_s5 }
  0x1d   : > { %208 = vperm.xlu0 %672, %v204_v1   ;;  %p678_p12 = scmp.ne.s32.totalorder %s915_s18, %s677_s30  ;;  %p685_p2 = scmp.lt.s32.totalorder %s683_s7, %s677_s30 }
  0x1f   : > { %p679_p13 = pnand %p678_p12, %p859_p4  ;;  %p686_p3 = por %p685_p2, %p684_p1 }
  0x21   : > { %p680_p0 = pneg %p679_p13 }
  0x23   : > { %p687_p5 = pnand %p686_p3, %p680_p0 }
  0x9c   : > { %v209_v3 = vpop.permute.xlu0 %208 }
  0x9d   : > { %v882_v4 = vmul.f32 %v585_v2, %v209_v3 }
  0x9f   : > { %v221_v5 = vand.u32 2139095040, %v882_v4  ;;  %v218_v6 = vand.u32 2147483647, %v882_v4  ;;  %vm220_vm7 = vcmp.lt.s32.totalorder %v882_v4, 0 }
  0xa1   : > { %v222_v7 = vshrl.u32 %v221_v5, 23  ;;  %v225_v9 = vand.u32 8388607, %v218_v6  ;;  %vm219_vm8 = vcmp.le.f32.partialorder %v218_v6, 0.7853982 }
  0xa3   : > { %v586_v8 = vadd.s32 4294967169, %v222_v7  ;;  %v226_v12 = vor.u32 8388608, %v225_v9 }
  0xa5   : > { %v228_v10 = vadd.s32 1, %v586_v8  ;;  %v266_v20 = vshll.u32 %v226_v12, 8 }
  0xa7   : > { %vm229_vm0 = vcmp.gt.s32.totalorder %v228_v10, 0 }
  0xa8   : > { %v230_v11 = vsel %vm229_vm0, %v228_v10, 0  ;;  %vm310_vm0 = vweird.f32 %v882_v4 }
  0xa9   : > { %v232_v13 = vand.u32 31, %v230_v11  ;;  %v231_v14 = vshrl.u32 %v230_v11, 5 }
  0xab   : > { %v233_v15 = vsub.s32 32, %v232_v13  ;;  %v244_v17 = vshll.u32 %v790_v16, %v232_v13  ;;  %v247_v19 = vshll.u32 %v791_v18, %v232_v13  ;;  %v235_v25 = vshll.u32 %v793_v24, %v232_v13 }
  0xac   : > { %v238_v28 = vshll.u32 %v794_v26, %v232_v13  ;;  %v241_v31 = vshll.u32 %v795_v29, %v232_v13  ;;  %vm253_vm1 = vcmp.lt.s32.totalorder %v231_v14, 4  ;;  %vm250_vm2 = vcmp.lt.s32.totalorder %v231_v14, 1 }
  0xad   : > { %v245_v21 = vshrl.u32 %v791_v18, %v233_v15  ;;  %v248_v23 = vshrl.u32 %v792_v22, %v233_v15  ;;  %v236_v27 = vshrl.u32 %v794_v26, %v233_v15  ;;  %v239_v30 = vshrl.u32 %v795_v29, %v233_v15 }
  0xae   : > { %v242_v32 = vshrl.u32 %v790_v16, %v233_v15  ;;  %v234_v36 = vshrl.u32 %v793_v24, %v233_v15  ;;  %vm251_vm3 = vcmp.lt.s32.totalorder %v231_v14, 2  ;;  %vm252_vm4 = vcmp.lt.s32.totalorder %v231_v14, 3 }
  0xaf   : > { %v246_v33 = vor.u32 %v245_v21, %v244_v17  ;;  %v249_v34 = vor.u32 %v248_v23, %v247_v19  ;;  %v237_v35 = vor.u32 %v236_v27, %v235_v25  ;;  %v240_v37 = vor.u32 %v239_v30, %v238_v28 }
  0xb0   : > { %v243_v38 = vor.u32 %v242_v32, %v241_v31 }
  0xb1   : > { %v259_v39 = vsel %vm253_vm1, %v246_v33, 920167782  ;;  %v263_v40 = vsel %vm253_vm1, %v249_v34, 1326507024  ;;  %v258_v42 = vsel %vm250_vm2, %v237_v35, %v240_v37  ;;  %v254_v45 = vsel %vm250_vm2, %v234_v36, %v237_v35 }
  0xb2   : > { %v255_v41 = vsel %vm253_vm1, %v243_v38, 2102212464  ;;  %v260_v43 = vsel %vm252_vm4, %v243_v38, %v259_v39  ;;  %v262_v44 = vsel %vm250_vm2, %v240_v37, %v243_v38  ;;  %v264_v48 = vsel %vm252_vm4, %v246_v33, %v263_v40 }
  0xb3   : > { %v256_v46 = vsel %vm252_vm4, %v240_v37, %v255_v41  ;;  %v261_v47 = vsel %vm251_vm3, %v258_v42, %v260_v43  ;;  %v265_v49 = vsel %vm251_vm3, %v262_v44, %v264_v48  ;;  %vm431_vm1 = vcmask 261248  }
  0xb4   : > { %v888_v50 = vmul.u32.u64.low %v266_v20, %v261_v47  ;;  %v889_v51 = vmul.u32.u64.high %v266_v20, %v261_v47, %v888_v50  ;;  %v891_v52 = vmul.u32.u64.low %v266_v20, %v265_v49  ;;  %v892_v53 = vmul.u32.u64.high %v266_v20, %v265_v49, %v891_v52 }
  0xb5   : > { %v257_v54 = vsel %vm251_vm3, %v254_v45, %v256_v46 }
  0xb6   : > { %v276_v55 = vadd.s32 1, %v889_v51  ;;  %v273_v56 = vmul.u32 %v266_v20, %v257_v54  ;;  %vm275_vm5 = vc.u32 %v892_v53, %v888_v50  ;;  %v274_v5 = vadd.s32 %v888_v50, %v892_v53 }
  0xb8   : > { %v277_v57 = vsel %vm275_vm5, %v276_v55, %v889_v51 }
  0xb9   : > { %v278_v58 = vadd.s32 %v277_v57, %v273_v56 }
  0xbb   : > { %v279_v59 = vadd.s32 536870912, %v278_v58 }
  0xbd   : > { %v280_v60 = vshrl.u32 %v279_v59, 30 }
  0xbf   : > { %v281_v61 = vshll.u32 %v280_v60, 30  ;;  %v304_v18 = vsub.s32 4, %v280_v60 }
  0xc1   : > { %v282_v62 = vsub.s32 %v278_v58, %v281_v61  ;;  %v305_v21 = vsel %vm220_vm7, %v304_v18, %v280_v60 }
  0xc2   : > { %v307_v23 = vsel %vm219_vm8, 0, %v305_v21 }
  0xc3   : > { %v284_v63 = vsub.s32 0, %v282_v62  ;;  %v414_v24 = vadd.s32 3, %v307_v23  ;;  %v311_v26 = vand.u32 3, %v307_v23 }
  0xc5   : > { %v587_v0 = vmin.u32 %v284_v63, %v282_v62  ;;  %v415_v25 = vand.u32 3, %v414_v24  ;;  %vm316_vm11 = vcmp.eq.s32.totalorder %v311_v26, 2  ;;  %vm313_vm13 = vcmp.eq.s32.totalorder %v311_v26, 0 }
  0xc6   : > { %vm312_vm15 = vcmp.lt.s32.totalorder %v311_v26, 2 }
  0xc7   : > { %v286_v1 = vclz %v587_v0  ;;  %vm420_vm9 = vcmp.eq.s32.totalorder %v415_v25, 2  ;;  %vm417_vm12 = vcmp.eq.s32.totalorder %v415_v25, 0  ;;  %vm416_vm14 = vcmp.lt.s32.totalorder %v415_v25, 2 }
  0xc9   : > { %v588_v2 = vadd.s32 4294967294, %v286_v1 }
  0xcb   : > { %vm589_vm6 = vcmp.lt.s32.totalorder %v588_v2, 0 }
  0xcc   : > { %v289_v3 = vsel %vm589_vm6, 0, %v588_v2 }
  0xcd   : > { %v290_v7 = vsub.s32 32, %v289_v3  ;;  %v294_v8 = vsub.s32 4294967266, %v289_v3  ;;  %v291_v9 = vshll.u32 %v282_v62, %v289_v3 }
  0xcf   : > { %v292_v10 = vshrl.u32 %v274_v5, %v290_v7  ;;  %v295_v11 = vadd.s32 127, %v294_v8 }
  0xd1   : > { %v293_v12 = vor.u32 %v292_v10, %v291_v9  ;;  %v296_v13 = vshll.u32 %v295_v11, 23 }
  0xd3   : > { %v297_v14 = vor.u32 4788187, %v296_v13  ;;  %v300_v16 = vcvt.s32.f32 %v293_v12 }
  0xd5   : > { %v298_v15 = vand.u32 2147483647, %v297_v14 }
  0xd7   : > { %v301_v17 = vmul.f32 %v300_v16, %v298_v15 }
  0xd9   : > { %v302_v19 = vxor.u32 2147483648, %v301_v17 }
  0xdb   : > { %v303_v20 = vsel %vm220_vm7, %v302_v19, %v301_v17 }
  0xdc   : > { %v306_v22 = vsel %vm219_vm8, %v882_v4, %v303_v20 }
  0xdd   : > { %673 = vcosq.f32 %v306_v22 }
  0xde   : > { %675 = vsinq.f32 %v306_v22 }
  0xe7   : > { %v674_v27 = vpop.eup %673 }
  0xe8   : > { %v676_v28 = vpop.eup %675  ;;  %v317_v29 = vxor.u32 2147483648, %v674_v27 }
  0xe9   : > { %v314_v30 = vxor.u32 2147483648, %v676_v28 }
  0xea   : > { %v422_v6 = vsel %vm420_vm9, %v317_v29, %v676_v28  ;;  %v318_v31 = vsel %vm316_vm11, %v317_v29, %v676_v28 }
  0xeb   : > { %v419_v32 = vsel %vm417_vm12, %v674_v27, %v314_v30  ;;  %v315_v33 = vsel %vm313_vm13, %v674_v27, %v314_v30 }
  0xec   : > { %v423_v34 = vsel %vm416_vm14, %v419_v32, %v422_v6  ;;  %v319_v35 = vsel %vm312_vm15, %v315_v33, %v318_v31 }
  0xed   : > { %v424_v36 = vsel %vm310_vm0, nan, %v423_v34  ;;  %v320_v37 = vsel %vm310_vm0, nan, %v319_v35 }
  0xee   : > { %435 = vrot.lane.b32.xlu1 %v424_v36, %s796_s8  ;;  %433 = vst.msk [vmem:[%s196_s9] sm:$0xff] %vm425_vm10, %v424_v36  ;;  %428 = vrot.lane.b32.xlu0 %v320_v37, %s796_s8  ;;  %426 = vst.msk [vmem:[%s189_s10] sm:$0xff] %vm425_vm10, %v320_v37 }
 0x160   : > { %v436_v4 = vpop.permute.xlu1 %435  ;;  %v429_v38 = vpop.permute.xlu0 %428 }
 0x161   : > { %432 = vst.msk [vmem:[%s189_s10] sm:$0xff] %vm431_vm1, %v429_v38  ;;  %438 = vst.msk [vmem:[%s196_s9] sm:$0xff] %vm431_vm1, %v436_v4 }
 0x162   : > { %690 = shalt.err (!%p687_p5)
}
 0x163   : > { %s691_s8 = scalar_lea.hbm %s913_s26, 128  ;;  %s695_s11 = scalar_lea.hbm %s992_s2, 256 }
 0x164   : > { %p692_p6 = scmp.ne.s32.totalorder %s913_s26, %s691_s8  ;;  %p696_p10 = scmp.lt.u32.totalorder %s913_s26, %s992_s2 }
 0x165   : > { %p697_p11 = scmp.lt.u32.totalorder %s695_s11, %s691_s8  ;;  %p699_p13 = scmp.lt.u32.totalorder %s691_s8, %s913_s26 }
 0x166   : > { %p693_p7 = pnand %p692_p6, %p859_p4 }
 0x167   : > { %p698_p12 = por %p697_p11, %p696_p10 }
 0x168   : > { %p694_p9 = pneg %p693_p7 }
 0x169   : > { %p700_p0 = por %p699_p13, %p698_p12 }
 0x16b   : > { %p701_p1 = pnand %p700_p0, %p694_p9 }
 0x16d   : > { %704 = shalt.err (!%p701_p1)
}
 0x16e   : > { %604 = dma.vmem_to_hbm [thread:$0]  (%p859_p4), %s915_s18, 128, %s913_s26, %s440_s15  }
 0x16f   : > { %s445_s27 = scalar_lea.sflag [#allocation5], %s903_s6  ;;  %s705_s28 = scalar_lea.vmem %s922_s19, 128 }
 0x170   : > { %p706_p2 = scmp.ne.s32.totalorder %s922_s19, %s705_s28  ;;  %s798_s30 = smov [#allocation4]  }
 0x171   : > { %s709_s4 = sshll.u32 %s798_s30, 4  ;;  %s710_s4 = int_to_ptr.vmem [resolvable:$false] %s709_s4 }
 0x172   : > { %p707_p3 = pnand %p706_p2, %p859_p4  ;;  %s711_s5 = scalar_lea.vmem %s710_s4, 256 }
 0x173   : > { %p712_p6 = scmp.lt.s32.totalorder %s922_s19, %s710_s4  ;;  %p713_p7 = scmp.lt.s32.totalorder %s711_s5, %s705_s28 }
 0x174   : > { %p708_p5 = pneg %p707_p3 }
 0x175   : > { %p714_p9 = por %p713_p7, %p712_p6 }
 0x177   : > { %p715_p10 = pnand %p714_p9, %p708_p5 }
 0x179   : > { %718 = shalt.err (!%p715_p10)
}
 0x17a   : > { %s719_s6 = scalar_lea.hbm %s920_s29, 128  ;;  %s723_s15 = scalar_lea.hbm %s993_s3, 256 }
 0x17b   : > { %p720_p11 = scmp.ne.s32.totalorder %s920_s29, %s719_s6  ;;  %p724_p0 = scmp.lt.u32.totalorder %s920_s29, %s993_s3 }
 0x17c   : > { %p725_p1 = scmp.lt.u32.totalorder %s723_s15, %s719_s6  ;;  %p727_p3 = scmp.lt.u32.totalorder %s719_s6, %s920_s29 }
 0x17d   : > { %p721_p12 = pnand %p720_p11, %p859_p4 }
 0x17e   : > { %p726_p2 = por %p725_p1, %p724_p0 }
 0x17f   : > { %p722_p13 = pneg %p721_p12 }
 0x180   : > { %p728_p5 = por %p727_p3, %p726_p2 }
 0x182   : > { %p729_p6 = pnand %p728_p5, %p722_p13 }
 0x184   : > { %732 = shalt.err (!%p729_p6)
}
 0x185   : > { %605 = dma.vmem_to_hbm [thread:$0]  (%p859_p4), %s922_s19, 128, %s920_s29, %s445_s27  }
 0x186 PF: > { %p615_p7 = scmp.ge.s32.totalorder %s787_s17, 2  ;;  %s485_s9 = sand.u32 1, %s767_s12  }
 0x187   : > { %s486_s10 = scalar_lea.sflag [#allocation3], %s485_s9 }
 0x188   : > { %p609_p9 = pnand %p615_p7, %p866_p8 }
 0x18a   : > { %758 = dma.done.wait (!%p609_p9), %s486_s10, 128  }
 0x18b   : > { %760 = vsyncadd (!%p609_p9), %s486_s10, 4294967168  ;;  %s495_s11 = scalar_lea.sflag [#allocation5], %s485_s9 }
 0x18c   : > { %762 = dma.done.wait (!%p609_p9), %s495_s11, 128  }
 0x18d   : > { %764 = vsyncadd (!%p609_p9), %s495_s11, 4294967168  ;;  %s20_s17 = sadd.s32 1, %s787_s17   ;;  %s996_s12 = smov %s771_s13 }
 0x18e   : > { %p17_p10 = scmp.ge.s32.totalorder %s20_s17, 4   ;;  %s997_s13 = smov %s775_s14 }
 0x18f   : > { %s998_s14 = smov %s872_s25  ;;  %s999_s15 = smov %s783_s16 }
 0x190   : > { %s1000_s16 = smov %s1002_s20  ;;  %19 = sbr.rel (!%p17_p10) target bundleno = 6 (0x6), region = 80 }
 0x197   :  { %500 = vsyncpa [#allocation3], 1 }
 0x198   :  { %502 = vsyncpa [#allocation3 + $0x1], 1 }
 0x199   :  { %503 = vsyncpa [#allocation5], 1 }
 0x19a   :  { %505 = vsyncpa [#allocation5 + $0x1], 1 }

</bundles_post_ra>
